<compile_context>
chip_gen: v7x
topology: tpu7x:2x2x1
jax: 0.10.0
libtpu: 0.0.40
codegen_flags: <defaults>
</compile_context>

<pallas_src>
import math
import numpy as np

import jax
import jax.numpy as jnp
from jax import lax
from jax.experimental import pallas as pl
from jax.experimental.pallas import tpu as pltpu


# ----------------------------- config ---------------------------------------
class Config:
    min_level = 3
    max_level = 5
    num_scales = 1
    aspect_ratios = (1.0, 2.0)
    anchor_scale = 4.0
    image_size = 64
    num_classes = 4
    alpha = 0.25
    gamma = 1.5          # focal gamma
    delta = 0.1          # huber delta
    box_loss_weight = 50.0
    match_threshold = 0.5


CFG = Config()
NUM_ANCHORS = CFG.num_scales * len(CFG.aspect_ratios)          # anchors per location (2)
NUM_CLASSES = CFG.num_classes                                  # 4
HIDDEN = 32                                                    # head hidden width
OUT_ROWS = NUM_ANCHORS * (NUM_CLASSES + 4)                     # 16 head output rows
NUM_POS = sum((CFG.image_size // 2 ** l) ** 2
              for l in range(CFG.min_level, CFG.max_level + 1))  # 84 positions/image
PPAD = ((NUM_POS + 127) // 128) * 128                          # 128 (lane-padded)


# ----------------------------- anchors (host glue) ---------------------------
def generate_anchors_by_type(cfg, ppad):
    """Anchors in (A, 4, PPAD) layout: anchor-type planes, rows y1,x1,y2,x2, lanes=positions."""
    cols = [[] for _ in range(NUM_ANCHORS)]
    for level in range(cfg.min_level, cfg.max_level + 1):
        stride = 2 ** level
        xs = np.arange(stride / 2.0, cfg.image_size, stride)
        ys = np.arange(stride / 2.0, cfg.image_size, stride)
        xv, yv = np.meshgrid(xs, ys)                            # y-major, x-minor
        a_idx = 0
        for octave in range(cfg.num_scales):
            for aspect in cfg.aspect_ratios:
                octave_scale = octave / float(cfg.num_scales)
                base = cfg.anchor_scale * stride * (2.0 ** octave_scale)
                ar = math.sqrt(aspect)
                half_w = base * ar / 2.0
                half_h = base / ar / 2.0
                boxes = np.stack([yv - half_h, xv - half_w,
                                  yv + half_h, xv + half_w], axis=0)     # (4, hl, hl)
                cols[a_idx].append(boxes.reshape(4, -1))
                a_idx += 1
    anc = np.stack([np.concatenate(c, axis=1) for c in cols], axis=0)    # (A, 4, P)
    p = anc.shape[2]
    # padded lanes get degenerate unit boxes (finite encodings, IoU never >= 0.5)
    pad = np.zeros((NUM_ANCHORS, 4, ppad - p), np.float32)
    pad[:, 2, :] = 1.0
    pad[:, 3, :] = 1.0
    return np.concatenate([anc.astype(np.float32), pad], axis=2)         # (A, 4, PPAD)


# ----------------------------- kernel 1: fused heads -------------------------
def _head_kernel(f_ref, ws_ref, bs_ref, w_ref, b_ref, out_ref):
    f = f_ref[...]                                   # (3, 128)  lane-dense positions
    ws = ws_ref[...]                                 # (HIDDEN, 3)
    # stem 3->HIDDEN as 3 VPU multiply-adds (degenerate K=3 kept off the MXU)
    h = (ws[:, 0:1] * f[0:1, :] + ws[:, 1:2] * f[1:2, :]
         + ws[:, 2:3] * f[2:3, :] + bs_ref[...])     # (HIDDEN, 128)
    h = jnp.maximum(h, 0.0)                          # ReLU
    # fused cls+box matmul, bf16 MXU with f32 accumulation, channel-major output
    out_ref[...] = (jnp.dot(w_ref[...], h.astype(jnp.bfloat16),
                            preferred_element_type=jnp.float32) + b_ref[...])


def run_heads(feat_t, params):
    n = feat_t.shape[1]                              # B * PPAD (multiple of 128)
    return pl.pallas_call(
        _head_kernel,
        out_shape=jax.ShapeDtypeStruct((OUT_ROWS, n), jnp.float32),
        grid=(n // 128,),
        in_specs=[pl.BlockSpec((3, 128), lambda i: (0, i)),
                  pl.BlockSpec((HIDDEN, 3), lambda i: (0, 0)),
                  pl.BlockSpec((HIDDEN, 1), lambda i: (0, 0)),
                  pl.BlockSpec((OUT_ROWS, HIDDEN), lambda i: (0, 0)),
                  pl.BlockSpec((OUT_ROWS, 1), lambda i: (0, 0))],
        out_specs=pl.BlockSpec((OUT_ROWS, 128), lambda i: (0, i)),
        compiler_params=pltpu.CompilerParams(dimension_semantics=("parallel",)),
    )(feat_t, params["w_stem"], params["b_stem"], params["w_head"], params["b_head"])


# ----------------------------- kernel 2: fused label + loss ------------------
def _label_loss_kernel(head_ref, anc_ref, gtc_ref, gtr_ref, out_ref):
    # head_ref: (16, P)       rows 0..7 cls logits (anchor-major, class-minor),
    #                         rows 8..15 box preds (anchor-major, coord-minor)
    # anc_ref : (A, 4, P)     anchor boxes, rows y1,x1,y2,x2, lanes = positions
    # gtc_ref : (1, G, 5)     GT columns: y1,x1,y2,x2,cls (1-based, -1 pad)
    # gtr_ref : (1, 8, G)     same GT transposed (rows), zero-padded to 8 rows
    # out_ref : (1, 1, 128)   lanes 0..2 = [focal_sum, huber_sum, npos]
    hd = head_ref[...]
    anc = anc_ref[...]
    gtc = gtc_ref[0]                                 # (G, 5)
    gtr = gtr_ref[0]                                 # (8, G)
    P = hd.shape[1]
    G = gtc.shape[0]

    gy1 = gtc[:, 0:1]; gx1 = gtc[:, 1:2]
    gy2 = gtc[:, 2:3]; gx2 = gtc[:, 3:4]             # (G, 1)
    gvalid = gtc[:, 4:5] > 0.0                       # (G, 1)
    area_g = (gy2 - gy1) * (gx2 - gx1)               # (G, 1)

    pos = lax.broadcasted_iota(jnp.int32, (1, P), 1)
    valid_pos = (pos < NUM_POS).astype(jnp.float32)  # (1, P) lane-padding mask

    focal_sum = jnp.zeros((1, 1), jnp.float32)
    huber_sum = jnp.zeros((1, 1), jnp.float32)
    npos = jnp.zeros((1, 1), jnp.float32)

    for a in range(NUM_ANCHORS):                     # static unroll (A = 2)
        ay1 = anc[a, 0:1, :]; ax1 = anc[a, 1:2, :]
        ay2 = anc[a, 2:3, :]; ax2 = anc[a, 3:4, :]   # (1, P)

        # pairwise IoU, lane-dense (G, P)
        iy1 = jnp.maximum(ay1, gy1); ix1 = jnp.maximum(ax1, gx1)
        iy2 = jnp.minimum(ay2, gy2); ix2 = jnp.minimum(ax2, gx2)
        inter = jnp.maximum(iy2 - iy1, 0.0) * jnp.maximum(ix2 - ix1, 0.0)
        area_a = (ay2 - ay1) * (ax2 - ax1)
        union = jnp.maximum(area_a + area_g - inter, 1e-8)
        iou = jnp.where(gvalid, inter / union, -1.0)

        # argmax over GT (first-max tie break) via sublane max + iota
        max_iou = jnp.max(iou, axis=0, keepdims=True)                    # (1, P)
        gidx = lax.broadcasted_iota(jnp.int32, (G, P), 0)
        first_max = jnp.min(jnp.where(iou >= max_iou, gidx, G),
                            axis=0, keepdims=True)
        sel = (gidx == first_max).astype(jnp.float32)                    # (G, P)
        matched = jnp.where(max_iou >= CFG.match_threshold, valid_pos, 0.0)
        npos = npos + jnp.sum(matched, keepdims=True)

        # matched-GT attribute gather as ONE MXU matmul (keeps XLU/VPU free)
        g = jnp.dot(gtr, sel, preferred_element_type=jnp.float32)        # (8, P)
        my1 = g[0:1, :]; mx1 = g[1:2, :]
        my2 = g[2:3, :]; mx2 = g[3:4, :]
        mcls = g[4:5, :]                                                 # 1-based class

        # ---------------- focal class loss on head rows [a*C, (a+1)*C) --------
        cls_ids = lax.broadcasted_iota(jnp.int32, (NUM_CLASSES, P), 0)
        oh = (cls_ids == (mcls.astype(jnp.int32) - 1)).astype(jnp.float32) * matched
        x = hd[a * NUM_CLASSES:(a + 1) * NUM_CLASSES, :]                 # (C, P)
        e = jnp.exp(-jnp.abs(x))
        r = pl.reciprocal(1.0 + e, approx=True)          # EUP vrcp (one cheap recip)
        p = jnp.where(x >= 0.0, r, 1.0 - r)               # sigmoid(x)
        p_t = oh * p + (1.0 - oh) * (1.0 - p)
        alpha_f = oh * CFG.alpha + (1.0 - oh) * (1.0 - CFG.alpha)
        m = jnp.maximum(1.0 - p_t, 0.0)
        if CFG.gamma == 1.5:
            mod = m * jnp.sqrt(m)
        elif CFG.gamma == 2.0:
            mod = m * m
        else:
            mod = m ** CFG.gamma
        ce = jnp.maximum(x, 0.0) - x * oh + jnp.log(1.0 + e)    # stable BCE
        # TODO(synk): effdet ignore band (cls target -2) / force-match not reproduced.
        focal_sum = focal_sum + jnp.sum(alpha_f * mod * ce * valid_pos, keepdims=True)

        # ---------------- huber box loss on head rows [A*C + a*4, +4) ---------
        ah = ay2 - ay1; aw = ax2 - ax1
        acy = (ay1 + ay2) * 0.5; acx = (ax1 + ax2) * 0.5
        gh = jnp.maximum(my2 - my1, 1e-8); gw = jnp.maximum(mx2 - mx1, 1e-8)
        gcy = (my1 + my2) * 0.5; gcx = (mx1 + mx2) * 0.5
        enc = ((gcy - acy) / ah, (gcx - acx) / aw,
               jnp.log(gh / ah), jnp.log(gw / aw))                       # 4 x (1, P)
        bo = hd[NUM_ANCHORS * NUM_CLASSES + 4 * a:
                NUM_ANCHORS * NUM_CLASSES + 4 * a + 4, :]                # (4, P)
        for k in range(4):
            tk = enc[k] * matched                                        # (1, P)
            err = bo[k:k + 1, :] - tk
            ae = jnp.abs(err)
            quad = jnp.minimum(ae, CFG.delta)
            lin = ae - quad
            hub = 0.5 * quad * quad + CFG.delta * lin
            # effdet quirk kept: mask is "target coordinate != 0", not "matched anchor"
            huber_sum = huber_sum + jnp.sum(
                hub * (tk != 0.0).astype(jnp.float32), keepdims=True)

    lane = lax.broadcasted_iota(jnp.int32, (1, out_ref.shape[2]), 1)
    out_ref[0] = (jnp.where(lane == 0, focal_sum, 0.0)
                  + jnp.where(lane == 1, huber_sum, 0.0)
                  + jnp.where(lane == 2, npos, 0.0))


def label_and_loss(head_out, anchors, gt_cols, gt_rows):
    B, G, _ = gt_cols.shape
    return pl.pallas_call(
        _label_loss_kernel,
        grid=(B,),
        out_shape=jax.ShapeDtypeStruct((B, 1, 128), jnp.float32),
        in_specs=[pl.BlockSpec((OUT_ROWS, PPAD), lambda b: (0, b)),
                  pl.BlockSpec((NUM_ANCHORS, 4, PPAD), lambda b: (0, 0, 0)),
                  pl.BlockSpec((1, G, 5), lambda b: (b, 0, 0)),
                  pl.BlockSpec((1, 8, G), lambda b: (b, 0, 0))],
        out_specs=pl.BlockSpec((1, 1, 128), lambda b: (b, 0, 0)),
        compiler_params=pltpu.CompilerParams(dimension_semantics=("parallel",)),
    )(head_out, anchors, gt_cols, gt_rows)


# ----------------------------- DetBenchTrain forward -------------------------
def det_bench_train(x_nchw, target, params, anchors):
    cfg = CFG
    B = x_nchw.shape[0]
    H = cfg.image_size

    # "backbone" glue: strided average pooling per pyramid level, assembled
    # directly in the lane-dense (channel, batch*position) layout the head eats.
    # TODO(synk): real EfficientDet backbone + BiFPN.
    x = jnp.transpose(x_nchw, (1, 0, 2, 3)).astype(jnp.float32)      # (3, B, H, H)
    feats = []
    for level in range(cfg.min_level, cfg.max_level + 1):
        s = 2 ** level
        hl = H // s
        f = x.reshape(3, B, hl, s, hl, s).mean(axis=(3, 5))          # (3, B, hl, hl)
        feats.append(f.reshape(3, B, hl * hl))
    feat = jnp.concatenate(feats, axis=2)                            # (3, B, NUM_POS)
    feat = jnp.pad(feat, ((0, 0), (0, 0), (0, PPAD - NUM_POS)))
    feat = feat.reshape(3, B * PPAD)

    # kernel 1: one fused head call; output slab goes STRAIGHT into the loss
    # kernel (no wrapper reshape/transpose/slice of activations in between).
    head_out = run_heads(feat, params)                               # (16, B*PPAD)

    # tiny GT side tables in both orientations (8x5 floats per image) so the
    # fused label+loss kernel never transposes in-kernel.
    bbox = target["bbox"].astype(jnp.float32)                        # (B, G, 4)
    cls = target["cls"].astype(jnp.float32)[..., None]               # (B, G, 1)
    gt_cols = jnp.concatenate([bbox, cls], axis=-1)                  # (B, G, 5)
    gt_rows = jnp.concatenate(
        [jnp.transpose(gt_cols, (0, 2, 1)),
         jnp.zeros((B, 3, bbox.shape[1]), jnp.float32)], axis=1)     # (B, 8, G)

    # kernel 2: fused anchor labeling + detection loss, per-image partial sums
    parts = label_and_loss(head_out, anchors, gt_cols, gt_rows)      # (B, 1, 128)

    # final combine of per-image partials with EXACT divides (review correctness note)
    sums = jnp.sum(parts[:, 0, :3], axis=0)                          # [focal, huber, npos]
    npos = sums[2] + 1.0
    class_loss = sums[0] / npos
    box_loss = sums[1] / npos * 0.25
    loss = class_loss + cfg.box_loss_weight * box_loss
    return dict(loss=loss, class_loss=class_loss, box_loss=box_loss)


# ----------------------------- params / inputs -------------------------------
def init_params(key):
    k0, k1, k2 = jax.random.split(key, 3)
    w_cls = 0.05 * jax.random.normal(k1, (NUM_ANCHORS * NUM_CLASSES, HIDDEN), jnp.float32)
    w_box = 0.05 * jax.random.normal(k2, (NUM_ANCHORS * 4, HIDDEN), jnp.float32)
    w_head = jnp.concatenate([w_cls, w_box], axis=0)                 # (16, HIDDEN)
    b_head = jnp.zeros((OUT_ROWS, 1), jnp.float32)
    b_head = b_head.at[:NUM_ANCHORS * NUM_CLASSES].set(-4.595)       # prior prob ~0.01
    return dict(
        w_stem=0.1 * jax.random.normal(k0, (HIDDEN, 3), jnp.float32),
        b_stem=jnp.zeros((HIDDEN, 1), jnp.float32),
        w_head=w_head.astype(jnp.bfloat16),                          # bf16 MXU weights
        b_head=b_head,                                               # f32 bias post-acc
    )


def make_targets(key, batch, num_gt, cfg):
    k1, k2, k3, k4, k5 = jax.random.split(key, 5)
    n_valid = 3
    y1 = jax.random.uniform(k1, (batch, num_gt), minval=0.0, maxval=24.0)
    x1 = jax.random.uniform(k2, (batch, num_gt), minval=0.0, maxval=24.0)
    h = jax.random.uniform(k3, (batch, num_gt), minval=16.0, maxval=40.0)
    w = jax.random.uniform(k4, (batch, num_gt), minval=16.0, maxval=40.0)
    y2 = jnp.minimum(y1 + h, float(cfg.image_size))
    x2 = jnp.minimum(x1 + w, float(cfg.image_size))
    bbox = jnp.stack([y1, x1, y2, x2], axis=-1)                      # (B, G, 4)
    cls = 1 + jax.random.randint(k5, (batch, num_gt), 0, cfg.num_classes)
    valid = (jnp.arange(num_gt) < n_valid)[None, :]
    bbox = jnp.where(valid[..., None], bbox, -1.0).astype(jnp.float32)
    cls = jnp.where(valid, cls, -1).astype(jnp.int32)
    return dict(bbox=bbox, cls=cls)


if __name__ == "__main__":
    key = jax.random.PRNGKey(0)
    kx, kp, kt = jax.random.split(key, 3)

    B, G = 2, 8
    x = jax.random.normal(kx, (B, 3, CFG.image_size, CFG.image_size), jnp.float32)
    params = init_params(kp)
    target = make_targets(kt, B, G, CFG)
    anchors = jnp.asarray(generate_anchors_by_type(CFG, PPAD))       # (A, 4, PPAD)

    out = det_bench_train(x, target, params, anchors)
    out = {k: jax.block_until_ready(v) for k, v in out.items()}

    vals = np.array([float(out["loss"]), float(out["class_loss"]), float(out["box_loss"])])
    assert np.all(np.isfinite(vals)), f"non-finite losses: {vals}"
    print("KERNEL_OK")
</pallas_src>

<mosaic_0001>
module attributes {stable_mosaic.version = 11 : i64} {
  func.func @_head_kernel(%arg0: i32, %arg1: memref<3x128xf32, #tpu.memory_space<vmem>>, %arg2: memref<32x3xf32, #tpu.memory_space<vmem>>, %arg3: memref<32x1xf32, #tpu.memory_space<vmem>>, %arg4: memref<16x32xbf16, #tpu.memory_space<vmem>>, %arg5: memref<16x1xf32, #tpu.memory_space<vmem>>, %arg6: memref<16x128xf32, #tpu.memory_space<vmem>>) attributes {dimension_semantics = [#tpu.dimension_semantics<parallel>], iteration_bounds = array<i64: 2>, scalar_prefetch = 0 : i64, scratch_operands = 0 : i64, tpu.core_type = #tpu.core_type<tc>, window_params = [{transform_indices = @transform_0, window_bounds = array<i64: 3, 128>}, {pipeline_mode = #tpu.pipeline_mode<synchronous>, transform_indices = @transform_1, window_bounds = array<i64: 32, 3>}, {pipeline_mode = #tpu.pipeline_mode<synchronous>, transform_indices = @transform_2, window_bounds = array<i64: 32, 1>}, {pipeline_mode = #tpu.pipeline_mode<synchronous>, transform_indices = @transform_3, window_bounds = array<i64: 16, 32>}, {pipeline_mode = #tpu.pipeline_mode<synchronous>, transform_indices = @transform_4, window_bounds = array<i64: 16, 1>}, {transform_indices = @transform_5, window_bounds = array<i64: 16, 128>}]} {
    %c0 = arith.constant 0 : index
    %c0_0 = arith.constant 0 : index
    %0 = vector.load %arg1[%c0, %c0_0] : memref<3x128xf32, #tpu.memory_space<vmem>>, vector<3x128xf32>
    %c0_1 = arith.constant 0 : index
    %c0_2 = arith.constant 0 : index
    %1 = vector.load %arg2[%c0_1, %c0_2] : memref<32x3xf32, #tpu.memory_space<vmem>>, vector<32x3xf32>
    %2 = vector.extract_strided_slice %1 {offsets = [0, 0], sizes = [32, 1], strides = [1, 1]} : vector<32x3xf32> to vector<32x1xf32>
    %3 = vector.extract_strided_slice %0 {offsets = [0, 0], sizes = [1, 128], strides = [1, 1]} : vector<3x128xf32> to vector<1x128xf32>
    %4 = vector.broadcast %2 : vector<32x1xf32> to vector<32x128xf32>
    %5 = vector.broadcast %3 : vector<1x128xf32> to vector<32x128xf32>
    %6 = arith.mulf %4, %5 : vector<32x128xf32>
    %7 = vector.extract_strided_slice %1 {offsets = [0, 1], sizes = [32, 1], strides = [1, 1]} : vector<32x3xf32> to vector<32x1xf32>
    %8 = vector.extract_strided_slice %0 {offsets = [1, 0], sizes = [1, 128], strides = [1, 1]} : vector<3x128xf32> to vector<1x128xf32>
    %9 = vector.broadcast %7 : vector<32x1xf32> to vector<32x128xf32>
    %10 = vector.broadcast %8 : vector<1x128xf32> to vector<32x128xf32>
    %11 = arith.mulf %9, %10 : vector<32x128xf32>
    %12 = arith.addf %6, %11 : vector<32x128xf32>
    %13 = vector.extract_strided_slice %1 {offsets = [0, 2], sizes = [32, 1], strides = [1, 1]} : vector<32x3xf32> to vector<32x1xf32>
    %14 = vector.extract_strided_slice %0 {offsets = [2, 0], sizes = [1, 128], strides = [1, 1]} : vector<3x128xf32> to vector<1x128xf32>
    %15 = vector.broadcast %13 : vector<32x1xf32> to vector<32x128xf32>
    %16 = vector.broadcast %14 : vector<1x128xf32> to vector<32x128xf32>
    %17 = arith.mulf %15, %16 : vector<32x128xf32>
    %18 = arith.addf %12, %17 : vector<32x128xf32>
    %c0_3 = arith.constant 0 : index
    %c0_4 = arith.constant 0 : index
    %19 = vector.load %arg3[%c0_3, %c0_4] : memref<32x1xf32, #tpu.memory_space<vmem>>, vector<32x1xf32>
    %20 = vector.broadcast %19 : vector<32x1xf32> to vector<32x128xf32>
    %21 = arith.addf %18, %20 : vector<32x128xf32>
    %cst = arith.constant 0.000000e+00 : f32
    %22 = vector.broadcast %cst : f32 to vector<32x128xf32>
    %23 = arith.maximumf %21, %22 : vector<32x128xf32>
    %c0_5 = arith.constant 0 : index
    %c0_6 = arith.constant 0 : index
    %24 = vector.load %arg4[%c0_5, %c0_6] : memref<16x32xbf16, #tpu.memory_space<vmem>>, vector<16x32xbf16>
    %25 = arith.truncf %23 : vector<32x128xf32> to vector<32x128xbf16>
    %cst_7 = arith.constant dense<0.000000e+00> : vector<16x128xf32>
    %26 = tpu.matmul %24, %25, %cst_7 {dimension_numbers = #tpu.dot_dimension_numbers<[1], [0], [0], [1], [0, 0, 1, 1], [], []>} : vector<16x32xbf16>, vector<32x128xbf16>, vector<16x128xf32> -> vector<16x128xf32>
    %c0_8 = arith.constant 0 : index
    %c0_9 = arith.constant 0 : index
    %27 = vector.load %arg5[%c0_8, %c0_9] : memref<16x1xf32, #tpu.memory_space<vmem>>, vector<16x1xf32>
    %28 = vector.broadcast %27 : vector<16x1xf32> to vector<16x128xf32>
    %29 = arith.addf %26, %28 : vector<16x128xf32>
    %c0_10 = arith.constant 0 : index
    %c0_11 = arith.constant 0 : index
    %30 = vector.load %arg6[%c0_10, %c0_11] : memref<16x128xf32, #tpu.memory_space<vmem>>, vector<16x128xf32>
    tpu.vector_store %arg6[%c0_10, %c0_11], %29 {strides = array<i32>} : memref<16x128xf32, #tpu.memory_space<vmem>>, vector<16x128xf32>,
    return
  }
  func.func @transform_0(%arg0: i32) -> (i32, i32) {
    %c0_i32 = arith.constant 0 : i32
    %c0_i32_0 = arith.constant 0 : i32
    return %c0_i32, %arg0 : i32, i32
  }
  func.func @transform_1(%arg0: i32) -> (i32, i32) {
    %c0_i32 = arith.constant 0 : i32
    %c0_i32_0 = arith.constant 0 : i32
    %c0_i32_1 = arith.constant 0 : i32
    return %c0_i32, %c0_i32_0 : i32, i32
  }
  func.func @transform_2(%arg0: i32) -> (i32, i32) {
    %c0_i32 = arith.constant 0 : i32
    %c0_i32_0 = arith.constant 0 : i32
    %c0_i32_1 = arith.constant 0 : i32
    return %c0_i32, %c0_i32_0 : i32, i32
  }
  func.func @transform_3(%arg0: i32) -> (i32, i32) {
    %c0_i32 = arith.constant 0 : i32
    %c0_i32_0 = arith.constant 0 : i32
    %c0_i32_1 = arith.constant 0 : i32
    return %c0_i32, %c0_i32_0 : i32, i32
  }
  func.func @transform_4(%arg0: i32) -> (i32, i32) {
    %c0_i32 = arith.constant 0 : i32
    %c0_i32_0 = arith.constant 0 : i32
    %c0_i32_1 = arith.constant 0 : i32
    return %c0_i32, %c0_i32_0 : i32, i32
  }
  func.func @transform_5(%arg0: i32) -> (i32, i32) {
    %c0_i32 = arith.constant 0 : i32
    %c0_i32_0 = arith.constant 0 : i32
    return %c0_i32, %arg0 : i32, i32
  }
}

</mosaic_0001>

<bundles_post_ra>
// kernel: tpu_custom_call.1
= control target key start
LH: loop header
LB: loop body
LE: loop exit
PB: predicated region body
PF: predicated region fallthrough
CT: control target
= control target key end

     0   :  { %10 = vsyncpa [#allocation3], 0  ;;  %s803_s0 = inlined_call_operand.vmem [shape: f32[3,256], index: 0, kind: input, shape index: {}]   ;;  %s804_s1 = inlined_call_operand.vmem [shape: f32[32,3], index: 1, kind: input, shape index: {}]   ;;  %s805_s2 = inlined_call_operand.vmem [shape: f32[32,1], index: 2, kind: input, shape index: {}]   ;;  %s806_s3 = inlined_call_operand.vmem [shape: bf16[16,32], index: 3, kind: input, shape index: {}]   ;;  %s807_s4 = inlined_call_operand.vmem [shape: f32[16,1], index: 4, kind: input, shape index: {}]   ;;  %s808_s5 = inlined_call_operand.hbm [shape: f32[16,256], index: 5, kind: output, shape index: {}]  }
   0x1   :  { %12 = vsyncpa [#allocation3 + $0x1], 0  ;;  %s667_s18 = smov 0   ;;  %s669_s19 = smov 0  }
   0x2   :  { %s671_s20 = smov 0   ;;  %s673_s21 = smov 0  }
   0x3 LB: > { %s688_s22 = sadd.s32 4294967295, %s626_s21   ;;  %s485_s23 = sadd.s32 4294967294, %s626_s21   ;;  %s626_s21 = sphi %s673_s21, %s814_s21   ;;  %s622_s20 = sphi %s671_s20, %s813_s20   ;;  %s618_s19 = sphi %s669_s19, %s812_s19   ;;  %s614_s18 = sphi %s667_s18, %s811_s18  }
   0x4   : > { %s692_s24 = sadd.s32 1, %s626_s21   ;;  %s135_s25 = sadd.s32 1, %s622_s20 }
   0x5   : > { %s132_s26 = ssub.s32 %s626_s21, %s692_s24  ;;  %p145_p0 = scmp.ne.s32.totalorder %s622_s20, %s618_s19 }
   0x6   : > { %p133_p1 = scmp.eq.s32.totalorder %s132_s26, 0  ;;  %p146_p2 = scmp.eq.s32.totalorder %s688_s22, 1 }
   0x7   : > { %p151_p3 = scmp.ne.s32.totalorder %s618_s19, %s614_s18  ;;  %p152_p4 = scmp.eq.s32.totalorder %s485_s23, 1 }
   0x8   : > { %s703_s27 = scalar_select %p133_p1, %s622_s20, %s135_s25  }
   0x9   : > { %p705_p5 = por %p146_p2, %p145_p0  ;;  %p709_p6 = por %p152_p4, %p151_p3 }
   0xa   : > { %p488_p7 = scmp.ge.s32.totalorder %s626_s21, 1  ;;  %p189_p8 = scmp.lt.s32.totalorder %s626_s21, 3 }
   0xc   : > { %p190_p9 = pnand %p488_p7, %p189_p8 }
   0xd   : > { %v222_v0 = vld [vmem:[%s804_s1] sm:$0xff] (!%p190_p9)  ;;  %v628_v1 = vmov (!%p190_p9), 2   ;;  %v629_v2 = vmov (!%p190_p9), 1   ;;  %v224_v3 = vld [vmem:[%s804_s1 + $0x10] sm:$0xff] (!%p190_p9)  ;;  %v223_v4 = vld [vmem:[%s804_s1 + $0x8] sm:$0xff] (!%p190_p9)  ;;  %v630_v5 = vmov (!%p190_p9), 0   ;;  %v246_v19 = vlaneseq (!%p190_p9) }
   0xe   : > { %193 = sbr.rel (%p190_p9) target bundleno = 425 (0x1a9), region = 40  ;;  %556 = vset.pattern.permute.xlu0 (!%p190_p9), %v628_v1  ;;  %555 = vset.pattern.permute.xlu1 (!%p190_p9), %v629_v2  ;;  %v225_v6 = vld [vmem:[%s804_s1 + $0x18] sm:$0xff] (!%p190_p9)  ;;  %v311_v7 = vld [vmem:[%s805_s2 + $0x8] sm:$0xff] (!%p190_p9)  ;;  %v346_v8 = vld [vmem:[%s807_s4] sm:$0xff] (!%p190_p9)  ;;  %v631_v12 = vmov (!%p190_p9), 0.0   ;;  %vm632_vm0 = vmmov (!%p190_p9), 0  }
   0xf   : > { %283 = vperm.xlu0 (!%p190_p9), %556, %v222_v0   ;;  %255 = vperm.xlu1 (!%p190_p9), %555, %v222_v0   ;;  %v310_v9 = vld [vmem:[%s805_s2] sm:$0xff] (!%p190_p9)  ;;  %v312_v10 = vld [vmem:[%s805_s2 + $0x10] sm:$0xff] (!%p190_p9)  ;;  %v313_v11 = vld [vmem:[%s805_s2 + $0x18] sm:$0xff] (!%p190_p9)  ;;  %p216_p10 = scmp.lt.s32.totalorder (!%p190_p9), %s688_s22, 1  ;;  %v247_v21 = vshrl.u32 (!%p190_p9), %v246_v19, 7  ;;  %vm363_vm1 = vcmask (!%p190_p9), 261120  }
  0x10   : > { %500 = vmatprep.subr.bf16.mxu0 (!%p190_p9), %v631_v12  ;;  %v347_v13 = vld [vmem:[%s807_s4 + $0x8] sm:$0xff] (!%p190_p9)  ;;  %504 = vmatprep.mubr.msk.bf16.mxu0 (!%p190_p9), %vm632_vm0, %v631_v12  ;;  %s213_s16 = sand.u32 (!%p190_p9), 1, %s618_s19   ;;  %s494_s26 = sshll.u32 (!%p190_p9), %s688_s22, 7 }
  0x11   : > { %v248_v23 = vsub.s32 (!%p190_p9), 0, %v247_v21  ;;  %v272_v25 = vsub.s32 (!%p190_p9), 1, %v247_v21  ;;  %v300_v28 = vsub.s32 (!%p190_p9), 2, %v247_v21  ;;  %s489_s17 = sshll.u32 (!%p190_p9), %s213_s16, 4  ;;  %s760_s7 = scalar_lea.hbm (!%p190_p9), %s808_s5, %s494_s26 }
  0x12   : > { %s215_s23 = scalar_lea.vmem (!%p190_p9), [#allocation2], %s489_s17 }
  0x13   : > { %291 = vperm.xlu0 (!%p190_p9), %556, %v224_v3   ;;  %259 = vperm.xlu1 (!%p190_p9), %555, %v223_v4   ;;  %s423_s25 = sshll.u32 (!%p190_p9), %s215_s23, 4  ;;  %s755_s25 = int_to_ptr.vmem [resolvable:$true] %s423_s25 }
  0x14   : > { %s564_s8 = scalar_lea.vmem (!%p190_p9), %s755_s25, 256 }
  0x15   : > { %s217_s9 = scalar_select %p216_p10, %s688_s22, 1 }
  0x16   : > { %s762_s22 = scalar_lea.sflag [#allocation3], %s213_s16  ;;  %p565_p11 = scmp.ne.s32.totalorder %s755_s25, %s564_s8 }
  0x17   : > { %560 = vset.pattern.permute.xlu0 %v630_v5  ;;  %557 = vset.pattern.permute.xlu1 %v628_v1  ;;  %s490_s10 = sshll.u32 %s217_s9, 2  ;;  %s633_s9 = smov [#allocation2]  }
  0x18   : > { %228 = vperm.xlu0 %560, %v222_v0   ;;  %287 = vperm.xlu1 %557, %v223_v4   ;;  %s219_s13 = scalar_lea.vmem %s803_s0, %s490_s10  ;;  %p566_p12 = pnand %p565_p11, %p705_p5 }
  0x19   : > { %v221_v26 = vld [vmem:[%s219_s13] sm:$0x7]  ;;  %s568_s10 = sshll.u32 %s633_s9, 4  ;;  %s569_s10 = int_to_ptr.vmem [resolvable:$false] %s568_s10 }
  0x1a   : > { %v249_v29 = vrot.slane %v221_v26, %v248_v23  ;;  %v273_v30 = vrot.slane %v221_v26, %v272_v25  ;;  %v301_v34 = vrot.slane %v221_v26, %v300_v28  ;;  %p567_p13 = pneg %p566_p12  ;;  %s570_s11 = scalar_lea.vmem %s569_s10, 512 }
  0x1b   : > { %p571_p0 = scmp.lt.s32.totalorder %s755_s25, %s569_s10  ;;  %p572_p1 = scmp.lt.s32.totalorder %s570_s11, %s564_s8 }
  0x1c   : > { %233 = vperm.xlu0 %560, %v223_v4   ;;  %558 = vset.pattern.permute.xlu1 %v630_v5 }
  0x1d   : > { %238 = vperm.xlu1 %558, %v224_v3   ;;  %p573_p2 = por %p572_p1, %p571_p0 }
  0x1f   : > { %p574_p3 = pnand %p573_p2, %p567_p13 }
  0x20   : > { %243 = vperm.xlu0 %560, %v225_v6  }
  0x21   : > { %559 = vset.pattern.permute.xlu1 %v629_v2 }
  0x22   : > { %263 = vperm.xlu1 %559, %v224_v3  }
  0x24   : > { %321 = vperm.xlu0 %560, %v311_v7  }
  0x26   : > { %267 = vperm.xlu1 %559, %v225_v6  }
  0x28   : > { %350 = vperm.xlu0 %560, %v346_v8  }
  0x2a   : > { %561 = vset.pattern.permute.xlu1 %v628_v1 }
  0x2b   : > { %295 = vperm.xlu1 %561, %v225_v6  }
  0x2f   : > { %562 = vset.pattern.permute.xlu1 %v630_v5  ;;  %v563_v5 = vld [vmem:[%s806_s3] sm:$0xff]  }
  0x30   : > { %316 = vperm.xlu1 %562, %v310_v9  }
  0x34   : > { %326 = vperm.xlu1 %562, %v312_v10  }
  0x38   : > { %331 = vperm.xlu1 %562, %v313_v11  }
  0x3c   : > { %355 = vperm.xlu1 %562, %v347_v13  }
  0x8e   : > { %v256_v14 = vpop.permute.xlu1 %255  ;;  %v284_v15 = vpop.permute.xlu0 %283 }
  0x8f   : > { %v274_v37 = vmul.f32 %v273_v30, %v256_v14  ;;  %v302_v39 = vmul.f32 %v301_v34, %v284_v15 }
  0x92   : > { %v260_v16 = vpop.permute.xlu1 %259  ;;  %v292_v17 = vpop.permute.xlu0 %291 }
  0x93   : > { %v275_v35 = vmul.f32 %v273_v30, %v260_v16  ;;  %v304_v54 = vmul.f32 %v301_v34, %v292_v17 }
  0x97   : > { %v288_v18 = vpop.permute.xlu1 %287  ;;  %v229_v20 = vpop.permute.xlu0 %228 }
  0x98   : > { %v250_v36 = vmul.f32 %v249_v29, %v229_v20  ;;  %v303_v41 = vmul.f32 %v301_v34, %v288_v18 }
  0x9a   : > { %v278_v40 = vadd.f32 %v274_v37, %v250_v36 }
  0x9b   : > { %v234_v24 = vpop.permute.xlu0 %233 }
  0x9c   : > { %v239_v22 = vpop.permute.xlu1 %238  ;;  %v251_v31 = vmul.f32 %v249_v29, %v234_v24  ;;  %v306_v48 = vadd.f32 %v302_v39, %v278_v40 }
  0x9d   : > { %v252_v46 = vmul.f32 %v249_v29, %v239_v22 }
  0x9e   : > { %v279_v38 = vadd.f32 %v275_v35, %v251_v31 }
  0x9f   : > { %v244_v32 = vpop.permute.xlu0 %243 }
  0xa0   : > { %v307_v45 = vadd.f32 %v303_v41, %v279_v38  ;;  %v253_v50 = vmul.f32 %v249_v29, %v244_v32 }
  0xa1   : > { %v264_v27 = vpop.permute.xlu1 %263 }
  0xa2   : > { %v276_v44 = vmul.f32 %v273_v30, %v264_v27 }
  0xa3   : > { %v322_v43 = vpop.permute.xlu0 %321 }
  0xa4   : > { %v335_v47 = vadd.f32 %v322_v43, %v307_v45  ;;  %v280_v51 = vadd.f32 %v276_v44, %v252_v46 }
  0xa5   : > { %v268_v33 = vpop.permute.xlu1 %267 }
  0xa6   : > { %v277_v52 = vmul.f32 %v273_v30, %v268_v33  ;;  %v339_v55 = vmax.f32 %v335_v47, 0.0  ;;  %v308_v60 = vadd.f32 %v304_v54, %v280_v51 }
  0xa7   : > { %v351_v6 = vpop.permute.xlu0 %350 }
  0xa8   : > { %v281_v59 = vadd.f32 %v277_v52, %v253_v50 }
  0xaa   : > { %v296_v42 = vpop.permute.xlu1 %295 }
  0xab   : > { %v305_v56 = vmul.f32 %v301_v34, %v296_v42 }
  0xad   : > { %v309_v63 = vadd.f32 %v305_v56, %v281_v59 }
  0xaf   : > { %v317_v49 = vpop.permute.xlu1 %316 }
  0xb0   : > { %v334_v53 = vadd.f32 %v317_v49, %v306_v48 }
  0xb2   : > { %v338_v57 = vmax.f32 %v334_v53, 0.0 }
  0xb3   : > { %v327_v58 = vpop.permute.xlu1 %326 }
  0xb4   : > { %v344_v61 = vpack.c.bf16 %v339_v55, %v338_v57  ;;  %v336_v62 = vadd.f32 %v327_v58, %v308_v60 }
  0xb6   : > { %501 = vmatpush3.bf16.msra.mxu0 %v344_v61  ;;  %v340_v2 = vmax.f32 %v336_v62, 0.0 }
  0xb7   : > { %v332_v0 = vpop.permute.xlu1 %331  ;;  %502 = vmatprep.subr.bf16.mxu0 %v631_v12 }
  0xb8   : > { %v337_v1 = vadd.f32 %v332_v0, %v309_v63 }
  0xba   : > { %v341_v3 = vmax.f32 %v337_v1, 0.0 }
  0xbb   : > { %v356_v10 = vpop.permute.xlu1 %355 }
  0xbc   : > { %v345_v4 = vpack.c.bf16 %v341_v3, %v340_v2 }
  0xbe   : > { %503 = vmatpush3.bf16.msra.mxu0 %v345_v4 }
  0xc1   : > { %505 = vmatmul.mubr.msk.bf16.vlgmr.msra.gmra.mrb[0].mxu0 %vm363_vm1, %v563_v5 }
 0x194   : > { %v401_v7 = vpop.f32.mrb[0].mxu0 }
 0x195   : > { %v402_v8 = vadd.f32 %v401_v7, %v351_v6  ;;  %v506_v9 = vpop.f32.mrb[1].mxu0 }
 0x196   : > { %v404_v11 = vpop.f32.mrb[2].mxu0 }
 0x197   : > { %408 = vst [vmem:[%s215_s23] sm:$0xff] %v402_v8  ;;  %v405_v12 = vadd.f32 %v404_v11, %v356_v10  ;;  %v507_v13 = vpop.f32.mrb[3].mxu0 }
 0x199   : > { %409 = vst [vmem:[%s215_s23 + $0x8] sm:$0xff] %v405_v12 }
 0x19a   : > { %577 = shalt.err (!%p574_p3)
}
 0x19b   : > { %s578_s12 = scalar_lea.hbm %s760_s7, 256  ;;  %s582_s15 = scalar_lea.hbm %s808_s5, 512 }
 0x19c   : > { %p579_p4 = scmp.ne.s32.totalorder %s760_s7, %s578_s12  ;;  %p583_p9 = scmp.lt.u32.totalorder %s760_s7, %s808_s5 }
 0x19d   : > { %p584_p10 = scmp.lt.u32.totalorder %s582_s15, %s578_s12  ;;  %p586_p12 = scmp.lt.u32.totalorder %s578_s12, %s760_s7 }
 0x19e   : > { %p580_p7 = pnand %p579_p4, %p705_p5 }
 0x19f   : > { %p585_p11 = por %p584_p10, %p583_p9 }
 0x1a0   : > { %p581_p8 = pneg %p580_p7 }
 0x1a1   : > { %p587_p13 = por %p586_p12, %p585_p11 }
 0x1a3   : > { %p588_p0 = pnand %p587_p13, %p581_p8 }
 0x1a5   : > { %591 = shalt.err (!%p588_p0)
}
 0x1a6   : > { %s634_s23 = smov 128   ;;  %s635_s26 = smov 256  }
 0x1a7   : > { %s636_s30 = smov 8  }
 0x1a8   : > { %508 = dma.vmem_to_hbm [thread:$0]  (%p705_p5), %s755_s25, 256, %s760_s7, %s762_s22, %s634_s23, %s635_s26, %s636_s30  }
 0x1a9 PF: > { %p514_p1 = scmp.ge.s32.totalorder %s626_s21, 2  ;;  %s438_s6 = sand.u32 1, %s614_s18  }
 0x1aa   : > { %s439_s8 = scalar_lea.sflag [#allocation3], %s438_s6 }
 0x1ab   : > { %p511_p2 = pnand %p514_p1, %p709_p6 }
 0x1ad   : > { %609 = dma.done.wait (!%p511_p2), %s439_s8, 256  }
 0x1ae   : > { %611 = vsyncadd (!%p511_p2), %s439_s8, 4294967040  ;;  %p15_p3 = scmp.ge.s32.totalorder %s692_s24, 4   ;;  %s811_s18 = smov %s618_s19 }
 0x1af   : > { %s812_s19 = smov %s622_s20  ;;  %s813_s20 = smov %s703_s27 }
 0x1b0   : > { %s814_s21 = smov %s692_s24  ;;  %17 = sbr.rel (!%p15_p3) target bundleno = 3 (0x3), region = 75 }
 0x1b7   :  { %444 = vsyncpa [#allocation3], 1 }
 0x1b8   :  { %446 = vsyncpa [#allocation3 + $0x1], 1 }

</bundles_post_ra>
